<compile_context>
chip_gen: v7x
topology: tpu7x:2x2x1
jax: 0.10.0
libtpu: 0.0.40
codegen_flags: <defaults>
</compile_context>

<pallas_src>
import jax
import jax.numpy as jnp
from jax.experimental import pallas as pl
from jax.experimental.pallas import tpu as pltpu

IN_FEATURES = 28 * 28      # 784
K_PAD = 896                # 7 * 128, lane-aligned contraction dim
HIDDEN = 128
OUT_FEATURES = 10
OUT_PAD = 128              # lane-dense output width


def _round_up(n, m):
    return (n + m - 1) // m * m


def _mlp_kernel(x_ref, w1_ref, b1_ref, w2_ref, b2_ref, o_ref):
    # x_ref: (TB, K_PAD) f32   w1_ref: (K_PAD, HIDDEN) bf16   b1_ref: (1, HIDDEN) f32
    # w2_ref: (HIDDEN, OUT_PAD) bf16   b2_ref: (1, OUT_PAD) f32   o_ref: (TB, OUT_PAD) f32
    x = x_ref[...].astype(jnp.bfloat16)                 # VPU cast; MXU-native input
    h = jnp.dot(x, w1_ref[...], preferred_element_type=jnp.float32)
    h = jnp.maximum(h + b1_ref[...], 0.0)               # bias + ReLU in f32
    y = jnp.dot(h.astype(jnp.bfloat16), w2_ref[...],
                preferred_element_type=jnp.float32)
    o_ref[...] = (y + b2_ref[...]).astype(o_ref.dtype)  # lane-dense (TB, 128) store


def mlp_forward(x, w1, b1, w2, b2, *, tile_batch=256):
    """Linear(784,128) -> ReLU -> Linear(128,10).

    x: (B, 784) f32; w1: (784, 128); b1: (1, 128); w2: (128, 10); b2: (1, 10).
    Returns (B, 10) f32.
    """
    batch = x.shape[0]

    # Batch tile: multiple of 8 sublanes, clamped to the (sublane-padded) batch.
    tb = min(tile_batch, _round_up(batch, 8))
    b_pad = _round_up(batch, tb)
    grid = (b_pad // tb,)

    # Zero-pad: batch -> whole tiles, K 784 -> 896, output 10 -> 128 lanes.
    # Weights go to bf16 once here (halves their HBM/VMEM footprint).
    x_p = jnp.pad(x, ((0, b_pad - batch), (0, K_PAD - IN_FEATURES)))
    w1_p = jnp.pad(w1, ((0, K_PAD - IN_FEATURES), (0, 0))).astype(jnp.bfloat16)
    b1_p = b1.astype(jnp.float32)
    w2_p = jnp.pad(w2, ((0, 0), (0, OUT_PAD - OUT_FEATURES))).astype(jnp.bfloat16)
    b2_p = jnp.pad(b2, ((0, 0), (0, OUT_PAD - OUT_FEATURES))).astype(jnp.float32)

    flops = 2 * b_pad * K_PAD * HIDDEN + 2 * b_pad * HIDDEN * OUT_PAD
    bytes_accessed = (x_p.size * 4 + w1_p.size * 2 + w2_p.size * 2
                      + b1_p.size * 4 + b2_p.size * 4 + b_pad * OUT_PAD * 4)

    out = pl.pallas_call(
        _mlp_kernel,
        out_shape=jax.ShapeDtypeStruct((b_pad, OUT_PAD), jnp.float32),
        grid_spec=pltpu.PrefetchScalarGridSpec(
            num_scalar_prefetch=0,
            grid=grid,
            in_specs=[
                pl.BlockSpec((tb, K_PAD), lambda i: (i, 0)),        # x: batch-tiled
                pl.BlockSpec((K_PAD, HIDDEN), lambda i: (0, 0)),    # w1: VMEM-resident
                pl.BlockSpec((1, HIDDEN), lambda i: (0, 0)),        # b1: resident
                pl.BlockSpec((HIDDEN, OUT_PAD), lambda i: (0, 0)),  # w2: resident
                pl.BlockSpec((1, OUT_PAD), lambda i: (0, 0)),       # b2: resident
            ],
            out_specs=pl.BlockSpec((tb, OUT_PAD), lambda i: (i, 0)),
        ),
        compiler_params=pltpu.CompilerParams(
            dimension_semantics=("parallel",),   # v7x: split batch tiles over 2 TCs
        ),
        cost_estimate=pl.CostEstimate(
            flops=flops, transcendentals=0, bytes_accessed=bytes_accessed),
    )(x_p, w1_p, b1_p, w2_p, b2_p)

    # Strip batch padding and the lane padding of the 10-wide output.
    return out[:batch, :OUT_FEATURES]


def init_params(key):
    """Deterministic PyTorch-style init: U(-1/sqrt(fan_in), 1/sqrt(fan_in))."""
    k1, k2, k3, k4 = jax.random.split(key, 4)
    bound1 = 1.0 / (IN_FEATURES ** 0.5)
    bound2 = 1.0 / (HIDDEN ** 0.5)
    # Stored as (in, out) — transposed w.r.t. torch's (out, in) layout.
    w1 = jax.random.uniform(k1, (IN_FEATURES, HIDDEN), jnp.float32, -bound1, bound1)
    b1 = jax.random.uniform(k2, (1, HIDDEN), jnp.float32, -bound1, bound1)
    w2 = jax.random.uniform(k3, (HIDDEN, OUT_FEATURES), jnp.float32, -bound2, bound2)
    b2 = jax.random.uniform(k4, (1, OUT_FEATURES), jnp.float32, -bound2, bound2)
    return w1, b1, w2, b2


def reference_forward(x, w1, b1, w2, b2):
    h = jnp.maximum(x @ w1 + b1, 0.0)
    return h @ w2 + b2


if __name__ == "__main__":
    key = jax.random.PRNGKey(0)
    kx, kp = jax.random.split(key)
    w1, b1, w2, b2 = init_params(kp)

    # Small smoke test (single batch tile).
    batch = 8
    x = jax.random.normal(kx, (batch, IN_FEATURES), jnp.float32)
    out = jax.block_until_ready(mlp_forward(x, w1, b1, w2, b2))
    ref = reference_forward(x, w1, b1, w2, b2)
    assert out.shape == (batch, OUT_FEATURES)
    # bf16 matmul inputs (f32 accumulation) -> loose tolerance vs. f32 reference.
    assert jnp.allclose(out, ref, atol=3e-2, rtol=3e-2), \
        float(jnp.max(jnp.abs(out - ref)))

    # Exercise grid > 1 and ragged-batch padding/masking path.
    batch2 = 200
    x2 = jax.random.normal(jax.random.PRNGKey(1), (batch2, IN_FEATURES), jnp.float32)
    out2 = jax.block_until_ready(mlp_forward(x2, w1, b1, w2, b2, tile_batch=64))
    ref2 = reference_forward(x2, w1, b1, w2, b2)
    assert out2.shape == (batch2, OUT_FEATURES)
    assert jnp.allclose(out2, ref2, atol=3e-2, rtol=3e-2)

    print("KERNEL_OK")
</pallas_src>

<mosaic_0001>
module attributes {stable_mosaic.version = 11 : i64} {
  func.func @_mlp_kernel(%arg0: i32, %arg1: memref<8x896xf32, #tpu.memory_space<vmem>>, %arg2: memref<896x128xbf16, #tpu.memory_space<vmem>>, %arg3: memref<1x128xf32, #tpu.memory_space<vmem>>, %arg4: memref<128x128xbf16, #tpu.memory_space<vmem>>, %arg5: memref<1x128xf32, #tpu.memory_space<vmem>>, %arg6: memref<8x128xf32, #tpu.memory_space<vmem>>) attributes {dimension_semantics = [#tpu.dimension_semantics<parallel>], iteration_bounds = array<i64: 1>, scalar_prefetch = 0 : i64, scratch_operands = 0 : i64, tpu.core_type = #tpu.core_type<tc>, window_params = [{transform_indices = @transform_0, window_bounds = array<i64: 8, 896>}, {pipeline_mode = #tpu.pipeline_mode<synchronous>, transform_indices = @transform_1, window_bounds = array<i64: 896, 128>}, {pipeline_mode = #tpu.pipeline_mode<synchronous>, transform_indices = @transform_2, window_bounds = array<i64: 1, 128>}, {pipeline_mode = #tpu.pipeline_mode<synchronous>, transform_indices = @transform_3, window_bounds = array<i64: 128, 128>}, {pipeline_mode = #tpu.pipeline_mode<synchronous>, transform_indices = @transform_4, window_bounds = array<i64: 1, 128>}, {transform_indices = @transform_5, window_bounds = array<i64: 8, 128>}]} {
    %c0 = arith.constant 0 : index
    %c0_0 = arith.constant 0 : index
    %0 = vector.load %arg1[%c0, %c0_0] : memref<8x896xf32, #tpu.memory_space<vmem>>, vector<8x896xf32>
    %1 = arith.truncf %0 : vector<8x896xf32> to vector<8x896xbf16>
    %c0_1 = arith.constant 0 : index
    %c0_2 = arith.constant 0 : index
    %2 = vector.load %arg2[%c0_1, %c0_2] : memref<896x128xbf16, #tpu.memory_space<vmem>>, vector<896x128xbf16>
    %cst = arith.constant dense<0.000000e+00> : vector<8x128xf32>
    %3 = tpu.matmul %1, %2, %cst {dimension_numbers = #tpu.dot_dimension_numbers<[1], [0], [0], [1], [0, 0, 1, 1], [], []>} : vector<8x896xbf16>, vector<896x128xbf16>, vector<8x128xf32> -> vector<8x128xf32>
    %c0_3 = arith.constant 0 : index
    %c0_4 = arith.constant 0 : index
    %4 = vector.load %arg3[%c0_3, %c0_4] : memref<1x128xf32, #tpu.memory_space<vmem>>, vector<1x128xf32>
    %5 = vector.broadcast %4 : vector<1x128xf32> to vector<8x128xf32>
    %6 = arith.addf %3, %5 : vector<8x128xf32>
    %cst_5 = arith.constant 0.000000e+00 : f32
    %7 = vector.broadcast %cst_5 : f32 to vector<8x128xf32>
    %8 = arith.maximumf %6, %7 : vector<8x128xf32>
    %9 = arith.truncf %8 : vector<8x128xf32> to vector<8x128xbf16>
    %c0_6 = arith.constant 0 : index
    %c0_7 = arith.constant 0 : index
    %10 = vector.load %arg4[%c0_6, %c0_7] : memref<128x128xbf16, #tpu.memory_space<vmem>>, vector<128x128xbf16>
    %cst_8 = arith.constant dense<0.000000e+00> : vector<8x128xf32>
    %11 = tpu.matmul %9, %10, %cst_8 {dimension_numbers = #tpu.dot_dimension_numbers<[1], [0], [0], [1], [0, 0, 1, 1], [], []>} : vector<8x128xbf16>, vector<128x128xbf16>, vector<8x128xf32> -> vector<8x128xf32>
    %c0_9 = arith.constant 0 : index
    %c0_10 = arith.constant 0 : index
    %12 = vector.load %arg5[%c0_9, %c0_10] : memref<1x128xf32, #tpu.memory_space<vmem>>, vector<1x128xf32>
    %13 = vector.broadcast %12 : vector<1x128xf32> to vector<8x128xf32>
    %14 = arith.addf %11, %13 : vector<8x128xf32>
    %c0_11 = arith.constant 0 : index
    %c0_12 = arith.constant 0 : index
    %15 = vector.load %arg6[%c0_11, %c0_12] : memref<8x128xf32, #tpu.memory_space<vmem>>, vector<8x128xf32>
    tpu.vector_store %arg6[%c0_11, %c0_12], %14 {strides = array<i32>} : memref<8x128xf32, #tpu.memory_space<vmem>>, vector<8x128xf32>,
    return
  }
  func.func @transform_0(%arg0: i32) -> (i32, i32) {
    %c0_i32 = arith.constant 0 : i32
    %c0_i32_0 = arith.constant 0 : i32
    return %arg0, %c0_i32 : i32, i32
  }
  func.func @transform_1(%arg0: i32) -> (i32, i32) {
    %c0_i32 = arith.constant 0 : i32
    %c0_i32_0 = arith.constant 0 : i32
    %c0_i32_1 = arith.constant 0 : i32
    return %c0_i32, %c0_i32_0 : i32, i32
  }
  func.func @transform_2(%arg0: i32) -> (i32, i32) {
    %c0_i32 = arith.constant 0 : i32
    %c0_i32_0 = arith.constant 0 : i32
    %c0_i32_1 = arith.constant 0 : i32
    return %c0_i32, %c0_i32_0 : i32, i32
  }
  func.func @transform_3(%arg0: i32) -> (i32, i32) {
    %c0_i32 = arith.constant 0 : i32
    %c0_i32_0 = arith.constant 0 : i32
    %c0_i32_1 = arith.constant 0 : i32
    return %c0_i32, %c0_i32_0 : i32, i32
  }
  func.func @transform_4(%arg0: i32) -> (i32, i32) {
    %c0_i32 = arith.constant 0 : i32
    %c0_i32_0 = arith.constant 0 : i32
    %c0_i32_1 = arith.constant 0 : i32
    return %c0_i32, %c0_i32_0 : i32, i32
  }
  func.func @transform_5(%arg0: i32) -> (i32, i32) {
    %c0_i32 = arith.constant 0 : i32
    %c0_i32_0 = arith.constant 0 : i32
    return %arg0, %c0_i32 : i32, i32
  }
}

</mosaic_0001>

<bundles_post_ra>
// kernel: tpu_custom_call.1
= control target key start
LH: loop header
LB: loop body
LE: loop exit
PB: predicated region body
PF: predicated region fallthrough
CT: control target
= control target key end

     0   :  { %10 = vsyncpa [#allocation3], 0  ;;  %s1294_s0 = inlined_call_operand.hbm [shape: f32[8,896], index: 0, kind: input, shape index: {}]   ;;  %s1295_s1 = inlined_call_operand.hbm [shape: bf16[896,128], index: 1, kind: input, shape index: {}]   ;;  %s1296_s2 = inlined_call_operand.vmem [shape: f32[1,128], index: 2, kind: input, shape index: {}]   ;;  %s1297_s3 = inlined_call_operand.hbm [shape: bf16[128,128], index: 3, kind: input, shape index: {}]   ;;  %s1298_s4 = inlined_call_operand.vmem [shape: f32[1,128], index: 4, kind: input, shape index: {}]   ;;  %s1299_s5 = inlined_call_operand.hbm [shape: f32[8,128], index: 5, kind: output, shape index: {}]  }
   0x1   :  { %11 = vsyncpa [#allocation6], 0 }
   0x2   :  { %12 = vsyncpa [#allocation4], 0  ;;  %s1176_s18 = smov [#allocation5]   ;;  %s1082_s22 = scalar_lea.hbm %s1295_s1, 7168 }
   0x3   :  { %s28_s19 = sshll.u32 %s1176_s18, 4  ;;  %p1083_p0 = scmp.ne.s32.totalorder %s1295_s1, %s1082_s22  ;;  %s29_s19 = int_to_ptr.vmem [resolvable:$true] %s28_s19 }
   0x4   :  { %p1086_p1 = scmp.lt.u32.totalorder %s1082_s22, %s1295_s1 }
   0x6   :  { %p1088_p2 = pnand %p1086_p1, %p1083_p0 }
   0x8   :  { %1091 = shalt.err (!%p1088_p2)
}
   0x9   :  { %s1092_s27 = scalar_lea.vmem %s29_s19, 7168  ;;  %p1097_p4 = scmp.lt.s32.totalorder %s29_s19, %s29_s19 }
   0xa   :  { %p1093_p3 = scmp.ne.s32.totalorder %s29_s19, %s1092_s27  ;;  %p1098_p5 = scmp.lt.s32.totalorder %s1092_s27, %s1092_s27 }
   0xc   :  { %p1099_p6 = por %p1098_p5, %p1097_p4 }
   0xe   :  { %p1100_p7 = pnand %p1099_p6, %p1093_p3 }
  0x10   :  { %1103 = shalt.err (!%p1100_p7)
}
  0x11   :  { %s1177_s28 = smov 64   ;;  %s1178_s29 = smov 4  }
  0x12   :  { %34 = dma.hbm_to_vmem [thread:$0]  %s1295_s1, 7168, %s29_s19, [#allocation6], %s1177_s28, %s1177_s28, %s1178_s29  }
  0x13   :  { %s1179_s7 = smov [#allocation2]   ;;  %s1180_s9 = smov [#allocation7]  }
  0x14   :  { %s19_s8 = sshll.u32 %s1179_s7, 4  ;;  %s42_s10 = sshll.u32 %s1180_s9, 4  ;;  %s20_s8 = int_to_ptr.vmem [resolvable:$true] %s19_s8  ;;  %s43_s10 = int_to_ptr.vmem [resolvable:$true] %s42_s10 }
  0x15   :  { %s1104_s13 = scalar_lea.hbm %s1294_s0, 896 }
  0x16   :  { %p1105_p8 = scmp.ne.s32.totalorder %s1294_s0, %s1104_s13  ;;  %p1108_p9 = scmp.lt.u32.totalorder %s1104_s13, %s1294_s0 }
  0x18   :  { %p1110_p10 = pnand %p1108_p9, %p1105_p8 }
  0x1a   :  { %1113 = shalt.err (!%p1110_p10)
}
  0x1b   :  { %s1114_s1 = scalar_lea.vmem %s20_s8, 896  ;;  %p1119_p12 = scmp.lt.s32.totalorder %s20_s8, %s20_s8 }
  0x1c   :  { %p1115_p11 = scmp.ne.s32.totalorder %s20_s8, %s1114_s1  ;;  %p1120_p13 = scmp.lt.s32.totalorder %s1114_s1, %s1114_s1 }
  0x1e   :  { %p1121_p0 = por %p1120_p13, %p1119_p12 }
  0x20   :  { %p1122_p1 = pnand %p1121_p0, %p1115_p11 }
  0x22   :  { %1125 = shalt.err (!%p1122_p1)
}
  0x23   :  { %22 = dma.hbm_to_vmem [thread:$0]  %s1294_s0, 896, %s20_s8, [#allocation3]  }
  0x24   :  { %s1126_s22 = scalar_lea.hbm %s1297_s3, 1024 }
  0x25   :  { %p1127_p2 = scmp.ne.s32.totalorder %s1297_s3, %s1126_s22  ;;  %p1130_p3 = scmp.lt.u32.totalorder %s1126_s22, %s1297_s3 }
  0x27   :  { %p1132_p4 = pnand %p1130_p3, %p1127_p2 }
  0x29   :  { %1135 = shalt.err (!%p1132_p4)
}
  0x2a   :  { %s1136_s27 = scalar_lea.vmem %s43_s10, 1024  ;;  %p1141_p6 = scmp.lt.s32.totalorder %s43_s10, %s43_s10 }
  0x2b   :  { %p1137_p5 = scmp.ne.s32.totalorder %s43_s10, %s1136_s27  ;;  %p1142_p7 = scmp.lt.s32.totalorder %s1136_s27, %s1136_s27 }
  0x2d   :  { %p1143_p8 = por %p1142_p7, %p1141_p6 }
  0x2f   :  { %p1144_p9 = pnand %p1143_p8, %p1137_p5 }
  0x31   :  { %1147 = shalt.err (!%p1144_p9)
}
  0x32   :  { %48 = dma.hbm_to_vmem [thread:$0]  %s1297_s3, 1024, %s43_s10, [#allocation6], %s1177_s28, %s1177_s28, %s1178_s29  }
  0x33   :  { %1170 = dma.done.wait [#allocation3], 896  }
  0x34   :  { %1171 = vsyncadd [#allocation3], 4294966400 }
  0x35   :  { %1172 = dma.done.wait [#allocation6], 8192  }
  0x36   :  { %1173 = vsyncadd [#allocation6], 4294959104  ;;  %v1018_v0 = vld [vmem:[#allocation5 + $0x40] sm:$0xff]   ;;  %v1022_v4 = vld [vmem:[#allocation5 + $0x48] sm:$0xff]   ;;  %v1181_v43 = vmov 0.0   ;;  %vm1182_vm0 = vmmov 0  }
  0x37   :  { %v1019_v1 = vld [vmem:[#allocation5] sm:$0xff]   ;;  %886 = vmatprep.subr.bf16.mxu0 %v1018_v0  ;;  %v1023_v5 = vld [vmem:[#allocation5 + $0x8] sm:$0xff]   ;;  %v1026_v8 = vld [vmem:[#allocation5 + $0x50] sm:$0xff]   ;;  %s1183_s6 = smov [#allocation8]  }
  0x38   :  { %v1020_v2 = vld [vmem:[#allocation5 + $0xc0] sm:$0xff]   ;;  %887 = vmatpush3.bf16.msra.mxu0 %v1019_v1  ;;  %v1024_v6 = vld [vmem:[#allocation5 + $0xc8] sm:$0xff]   ;;  %v1027_v9 = vld [vmem:[#allocation5 + $0x10] sm:$0xff]   ;;  %s810_s7 = sshll.u32 %s1183_s6, 4  ;;  %s811_s7 = int_to_ptr.vmem [resolvable:$true] %s810_s7 }
  0x39   :  { %v1021_v3 = vld [vmem:[#allocation5 + $0x80] sm:$0xff]   ;;  %908 = vmatprep.subr.bf16.mxu1 %v1020_v2  ;;  %888 = vmatprep.subr.bf16.mxu0 %v1022_v4  ;;  %v1025_v7 = vld [vmem:[#allocation5 + $0x88] sm:$0xff]   ;;  %v1028_v10 = vld [vmem:[#allocation5 + $0xd0] sm:$0xff]   ;;  %s1148_s8 = scalar_lea.vmem %s811_s7, 128  ;;  %p1153_p11 = scmp.lt.s32.totalorder %s811_s7, %s811_s7 }
  0x3a   :  { %909 = vmatpush3.bf16.msra.mxu1 %v1021_v3  ;;  %v1029_v11 = vld [vmem:[#allocation5 + $0x90] sm:$0xff]   ;;  %v1030_v12 = vld [vmem:[#allocation5 + $0x58] sm:$0xff]   ;;  %v1034_v16 = vld [vmem:[#allocation5 + $0x60] sm:$0xff]   ;;  %p1149_p10 = scmp.ne.s32.totalorder %s811_s7, %s1148_s8  ;;  %p1154_p12 = scmp.lt.s32.totalorder %s1148_s8, %s1148_s8 }
  0x3b   :  { %910 = vmatprep.subr.bf16.mxu1 %v1024_v6  ;;  %v1031_v13 = vld [vmem:[#allocation5 + $0x18] sm:$0xff]   ;;  %v1035_v17 = vld [vmem:[#allocation5 + $0x20] sm:$0xff]   ;;  %v1038_v20 = vld [vmem:[#allocation5 + $0x68] sm:$0xff]  }
  0x3c   :  { %889 = vmatpush3.bf16.msra.mxu0 %v1023_v5  ;;  %v1032_v14 = vld [vmem:[#allocation5 + $0xd8] sm:$0xff]   ;;  %v1036_v18 = vld [vmem:[#allocation5 + $0xe0] sm:$0xff]   ;;  %v1039_v21 = vld [vmem:[#allocation5 + $0x28] sm:$0xff]   ;;  %p1155_p13 = por %p1154_p12, %p1153_p11 }
  0x3d   :  { %890 = vmatprep.subr.bf16.mxu0 %v1026_v8  ;;  %v1033_v15 = vld [vmem:[#allocation5 + $0x98] sm:$0xff]   ;;  %v1037_v19 = vld [vmem:[#allocation5 + $0xa0] sm:$0xff]   ;;  %v1040_v22 = vld [vmem:[#allocation5 + $0xe8] sm:$0xff]  }
  0x3e   :  { %911 = vmatpush3.bf16.msra.mxu1 %v1025_v7  ;;  %v1041_v23 = vld [vmem:[#allocation5 + $0xa8] sm:$0xff]   ;;  %v1042_v24 = vld [vmem:[#allocation5 + $0x70] sm:$0xff]   ;;  %v1046_v28 = vld [vmem:[#allocation5 + $0x78] sm:$0xff]   ;;  %p1156_p0 = pnand %p1155_p13, %p1149_p10 }
  0x3f   :  { %912 = vmatprep.subr.bf16.mxu1 %v1028_v10  ;;  %v1043_v25 = vld [vmem:[#allocation5 + $0x30] sm:$0xff]   ;;  %v1047_v29 = vld [vmem:[#allocation5 + $0x38] sm:$0xff]   ;;  %v61_v34 = vld [vmem:[#allocation2] sm:$0xff] }
  0x40   :  { %891 = vmatpush3.bf16.msra.mxu0 %v1027_v9  ;;  %v1044_v26 = vld [vmem:[#allocation5 + $0xf0] sm:$0xff]   ;;  %v1048_v30 = vld [vmem:[#allocation5 + $0xf8] sm:$0xff]   ;;  %v68_v35 = vpack.c.bf16 %v61_v34, %v61_v34  ;;  %v1050_v36 = vld [vmem:[#allocation5 + $0x140] sm:$0xff]  }
  0x41   :  { %892 = vmatprep.subr.bf16.mxu0 %v1030_v12  ;;  %v1045_v27 = vld [vmem:[#allocation5 + $0xb0] sm:$0xff]   ;;  %v1049_v33 = vld [vmem:[#allocation5 + $0xb8] sm:$0xff]   ;;  %v64_v37 = vld [vmem:[#allocation2 + $0x18] sm:$0xff] }
  0x42   :  { %913 = vmatpush3.bf16.msra.mxu1 %v1029_v11  ;;  %v62_v31 = vld [vmem:[#allocation2 + $0x8] sm:$0xff]  ;;  %v71_v38 = vpack.c.bf16 %v64_v37, %v64_v37  ;;  %v1051_v39 = vld [vmem:[#allocation5 + $0x100] sm:$0xff]   ;;  %v63_v40 = vld [vmem:[#allocation2 + $0x10] sm:$0xff] }
  0x43   :  { %914 = vmatprep.subr.bf16.mxu1 %v1032_v14  ;;  %v69_v32 = vpack.c.bf16 %v62_v31, %v62_v31  ;;  %v70_v41 = vpack.c.bf16 %v63_v40, %v63_v40  ;;  %v1052_v42 = vld [vmem:[#allocation5 + $0x180] sm:$0xff]   ;;  %v1053_v44 = vld [vmem:[#allocation5 + $0x148] sm:$0xff]   ;;  %v1056_v47 = vld [vmem:[#allocation5 + $0x150] sm:$0xff]  }
  0x44   :  { %893 = vmatpush3.bf16.msra.mxu0 %v1031_v13  ;;  %602 = vmatprep.mubr.bf16.mxu1 %v71_v38  ;;  %v1054_v45 = vld [vmem:[#allocation5 + $0x108] sm:$0xff]   ;;  %v1057_v48 = vld [vmem:[#allocation5 + $0x110] sm:$0xff]   ;;  %v1059_v50 = vld [vmem:[#allocation5 + $0x158] sm:$0xff]  }
  0x45   :  { %894 = vmatprep.subr.bf16.mxu0 %v1034_v16  ;;  %562 = vmatprep.mubr.bf16.mxu0 %v69_v32  ;;  %v1055_v46 = vld [vmem:[#allocation5 + $0x188] sm:$0xff]   ;;  %v1058_v49 = vld [vmem:[#allocation5 + $0x190] sm:$0xff]   ;;  %v1060_v51 = vld [vmem:[#allocation5 + $0x118] sm:$0xff]  }
  0x46   :  { %915 = vmatpush3.bf16.msra.mxu1 %v1033_v15  ;;  %v1062_v52 = vld [vmem:[#allocation5 + $0x160] sm:$0xff]   ;;  %v1061_v53 = vld [vmem:[#allocation5 + $0x198] sm:$0xff]   ;;  %v1065_v55 = vld [vmem:[#allocation5 + $0x168] sm:$0xff]  }
  0x47   :  { %916 = vmatprep.subr.bf16.mxu1 %v1036_v18  ;;  %v1063_v54 = vld [vmem:[#allocation5 + $0x120] sm:$0xff]   ;;  %v1066_v57 = vld [vmem:[#allocation5 + $0x128] sm:$0xff]   ;;  %v1068_v58 = vld [vmem:[#allocation5 + $0x170] sm:$0xff]  }
  0x48   :  { %895 = vmatpush3.bf16.msra.mxu0 %v1035_v17  ;;  %v1064_v56 = vld [vmem:[#allocation5 + $0x1a0] sm:$0xff]   ;;  %v1067_v59 = vld [vmem:[#allocation5 + $0x1a8] sm:$0xff]   ;;  %v1069_v60 = vld [vmem:[#allocation5 + $0x130] sm:$0xff]  }
  0x49   :  { %896 = vmatprep.subr.bf16.mxu0 %v1038_v20  ;;  %v66_v61 = vld [vmem:[#allocation2 + $0x28] sm:$0xff]  ;;  %v1071_v63 = vld [vmem:[#allocation5 + $0x178] sm:$0xff]   ;;  %v65_v2 = vld [vmem:[#allocation2 + $0x20] sm:$0xff] }
  0x4a   :  { %917 = vmatpush3.bf16.msra.mxu1 %v1037_v19  ;;  %v1070_v62 = vld [vmem:[#allocation5 + $0x1b0] sm:$0xff]   ;;  %v73_v0 = vpack.c.bf16 %v66_v61, %v66_v61  ;;  %v1072_v1 = vld [vmem:[#allocation5 + $0x138] sm:$0xff]   ;;  %v72_v4 = vpack.c.bf16 %v65_v2, %v65_v2  ;;  %v1074_v7 = vld [vmem:[#allocation7] sm:$0xff]  }
  0x4b   :  { %918 = vmatprep.subr.bf16.mxu1 %v1040_v22  ;;  %v1073_v3 = vld [vmem:[#allocation5 + $0x1b8] sm:$0xff]   ;;  %v1075_v8 = vld [vmem:[#allocation7 + $0x8] sm:$0xff]   ;;  %v1076_v9 = vld [vmem:[#allocation7 + $0x10] sm:$0xff]  }
  0x4c   :  { %897 = vmatpush3.bf16.msra.mxu0 %v1039_v21  ;;  %v67_v5 = vld [vmem:[#allocation2 + $0x30] sm:$0xff]  ;;  %v1078_v11 = vld [vmem:[#allocation7 + $0x20] sm:$0xff]   ;;  %v1079_v12 = vld [vmem:[#allocation7 + $0x28] sm:$0xff]  }
  0x4d   :  { %898 = vmatprep.subr.bf16.mxu0 %v1042_v24  ;;  %v74_v6 = vpack.c.bf16 %v67_v5, %v67_v5  ;;  %v1077_v10 = vld [vmem:[#allocation7 + $0x18] sm:$0xff]   ;;  %v1080_v13 = vld [vmem:[#allocation7 + $0x30] sm:$0xff]   ;;  %v820_v16 = vld [vmem:[%s1296_s2] ss:$0 sm:$0xff] }
  0x4e   :  { %919 = vmatpush3.bf16.msra.mxu1 %v1041_v23  ;;  %v1081_v14 = vld [vmem:[#allocation7 + $0x38] sm:$0xff]  }
  0x4f   :  { %920 = vmatprep.subr.bf16.mxu1 %v1044_v26 }
  0x50   :  { %899 = vmatpush3.bf16.msra.mxu0 %v1043_v25 }
  0x51   :  { %900 = vmatprep.subr.bf16.mxu0 %v1046_v28 }
  0x52   :  { %921 = vmatpush3.bf16.msra.mxu1 %v1045_v27 }
  0x53   :  { %922 = vmatprep.subr.bf16.mxu1 %v1048_v30 }
  0x54   :  { %901 = vmatpush3.bf16.msra.mxu0 %v1047_v29 }
  0x55   :  { %930 = vmatprep.subr.bf16.mxu0 %v1050_v36 }
  0x56   :  { %923 = vmatpush3.bf16.msra.mxu1 %v1049_v33 }
  0x57   :  { %563 = vmatmul.mubr.bf16.vlgmr.msra.gmra.mrb[0].mxu0 %v68_v35  ;;  %970 = vmatprep.subr.bf16.mxu1 %v1181_v43 }
  0x58   :  { %931 = vmatpush3.bf16.msra.mxu0 %v1051_v39  ;;  %642 = vmatprep.mubr.bf16.mxu0 %v73_v0 }
  0x59   :  { %603 = vmatmul.mubr.bf16.vlgmr.msra.gmra.mrb[0].mxu1 %v70_v41  ;;  %932 = vmatprep.subr.bf16.mxu0 %v1053_v44  ;;  %v877_v41 = vld [vmem:[%s1298_s4] ss:$0 sm:$0xff] }
  0x5a   :  { %971 = vmatpush3.bf16.msra.mxu1 %v1052_v42  ;;  %986 = vmatprep.mubr.msk.bf16.mxu1 %vm1182_vm0, %v1181_v43 }
  0x5b   :  { %972 = vmatprep.subr.bf16.mxu1 %v1181_v43 }
  0x5c   :  { %933 = vmatpush3.bf16.msra.mxu0 %v1054_v45 }
  0x5d   :  { %934 = vmatprep.subr.bf16.mxu0 %v1056_v47 }
  0x5e   :  { %973 = vmatpush3.bf16.msra.mxu1 %v1055_v46 }
  0x5f   :  { %974 = vmatprep.subr.bf16.mxu1 %v1181_v43 }
  0x60   :  { %935 = vmatpush3.bf16.msra.mxu0 %v1057_v48 }
  0x61   :  { %936 = vmatprep.subr.bf16.mxu0 %v1059_v50 }
  0x62   :  { %975 = vmatpush3.bf16.msra.mxu1 %v1058_v49 }
  0x63   :  { %976 = vmatprep.subr.bf16.mxu1 %v1181_v43 }
  0x64   :  { %937 = vmatpush3.bf16.msra.mxu0 %v1060_v51 }
  0x65   :  { %938 = vmatprep.subr.bf16.mxu0 %v1062_v52 }
  0x66   :  { %977 = vmatpush3.bf16.msra.mxu1 %v1061_v53 }
  0x67   :  { %978 = vmatprep.subr.bf16.mxu1 %v1181_v43 }
  0x68   :  { %939 = vmatpush3.bf16.msra.mxu0 %v1063_v54 }
  0x69   :  { %940 = vmatprep.subr.bf16.mxu0 %v1065_v55 }
  0x6a   :  { %979 = vmatpush3.bf16.msra.mxu1 %v1064_v56 }
  0x6b   :  { %980 = vmatprep.subr.bf16.mxu1 %v1181_v43 }
  0x6c   :  { %941 = vmatpush3.bf16.msra.mxu0 %v1066_v57 }
  0x6d   :  { %942 = vmatprep.subr.bf16.mxu0 %v1068_v58 }
  0x6e   :  { %981 = vmatpush3.bf16.msra.mxu1 %v1067_v59 }
  0x6f   :  { %982 = vmatprep.subr.bf16.mxu1 %v1181_v43 }
  0x70   :  { %943 = vmatpush3.bf16.msra.mxu0 %v1069_v60 }
  0x71   :  { %944 = vmatprep.subr.bf16.mxu0 %v1071_v63 }
  0x72   :  { %983 = vmatpush3.bf16.msra.mxu1 %v1070_v62 }
  0x73   :  { %984 = vmatprep.subr.bf16.mxu1 %v1181_v43 }
  0x74   :  { %945 = vmatpush3.bf16.msra.mxu0 %v1072_v1 }
  0x75   :  { %990 = vmatprep.subr.bf16.mxu0 %v1181_v43 }
  0x76   :  { %985 = vmatpush3.bf16.msra.mxu1 %v1073_v3 }
  0x77   :  { %643 = vmatmul.mubr.bf16.vlgmr.msra.gmra.mrb[4].mxu0 %v72_v4 }
  0x78   :  { %1006 = vmatprep.mubr.msk.bf16.mxu0 %vm1182_vm0, %v1181_v43  ;;  %991 = vmatpush3.bf16.msra.mxu0 %v1074_v7 }
  0x79   :  { %987 = vmatmul.mubr.bf16.vlgmr.msra.gmra.mrb[4].mxu1 %v74_v6  ;;  %992 = vmatprep.subr.bf16.mxu0 %v1181_v43 }
  0x7c   :  { %993 = vmatpush3.bf16.msra.mxu0 %v1075_v8 }
  0x7d   :  { %994 = vmatprep.subr.bf16.mxu0 %v1181_v43 }
  0x80   :  { %995 = vmatpush3.bf16.msra.mxu0 %v1076_v9 }
  0x81   :  { %996 = vmatprep.subr.bf16.mxu0 %v1181_v43 }
  0x84   :  { %997 = vmatpush3.bf16.msra.mxu0 %v1077_v10 }
  0x85   :  { %998 = vmatprep.subr.bf16.mxu0 %v1181_v43 }
  0x88   :  { %999 = vmatpush3.bf16.msra.mxu0 %v1078_v11 }
  0x89   :  { %1000 = vmatprep.subr.bf16.mxu0 %v1181_v43 }
  0x8c   :  { %1001 = vmatpush3.bf16.msra.mxu0 %v1079_v12 }
  0x8d   :  { %1002 = vmatprep.subr.bf16.mxu0 %v1181_v43 }
  0x90   :  { %1003 = vmatpush3.bf16.msra.mxu0 %v1080_v13 }
  0x91   :  { %1004 = vmatprep.subr.bf16.mxu0 %v1181_v43 }
  0x94   :  { %1005 = vmatpush3.bf16.msra.mxu0 %v1081_v14 }
 0x12a   :  { %v902_v15 = vpop.f32.mrb[0].mxu0 }
 0x12b   :  { %v903_v17 = vpop.f32.mrb[1].mxu0 }
 0x12c   :  { %v904_v18 = vadd.f32 %v903_v17, %v902_v15  ;;  %v905_v19 = vpop.f32.mrb[2].mxu0  ;;  %v924_v20 = vpop.f32.mrb[0].mxu1 }
 0x12d   :  { %v906_v21 = vpop.f32.mrb[3].mxu0  ;;  %v925_v23 = vpop.f32.mrb[1].mxu1 }
 0x12e   :  { %v565_v22 = vadd.f32 %v904_v18, %v820_v16  ;;  %v926_v24 = vadd.f32 %v925_v23, %v924_v20  ;;  %v927_v25 = vpop.f32.mrb[2].mxu1 }
 0x12f   :  { %v928_v26 = vpop.f32.mrb[3].mxu1 }
 0x130   :  { %v605_v27 = vadd.f32 %v926_v24, %v565_v22 }
 0x14a   :  { %v946_v28 = vpop.f32.mrb[4].mxu0 }
 0x14b   :  { %v947_v29 = vpop.f32.mrb[5].mxu0 }
 0x14c   :  { %v948_v30 = vadd.f32 %v947_v29, %v946_v28  ;;  %v949_v31 = vpop.f32.mrb[6].mxu0  ;;  %v684_v32 = vpop.f32.mrb[4].mxu1 }
 0x14d   :  { %v950_v33 = vpop.f32.mrb[7].mxu0  ;;  %v988_v35 = vpop.f32.mrb[5].mxu1 }
 0x14e   :  { %v645_v34 = vadd.f32 %v948_v30, %v605_v27  ;;  %v687_v36 = vpop.f32.mrb[6].mxu1 }
 0x14f   :  { %v989_v38 = vpop.f32.mrb[7].mxu1 }
 0x150   :  { %v685_v37 = vadd.f32 %v684_v32, %v645_v34 }
 0x152   :  { %v690_v39 = vmax.f32 %v685_v37, 0.0 }
 0x154   :  { %v691_v40 = vpack.c.bf16 %v690_v39, %v690_v39 }
 0x156   :  { %1007 = vmatmul.mubr.bf16.vlgmr.msra.gmra.mrb[8].mxu0 %v691_v40 }
 0x229   :  { %v797_v42 = vpop.f32.mrb[8].mxu0 }
 0x22a   :  { %v798_v43 = vadd.f32 %v877_v41, %v797_v42  ;;  %v1008_v44 = vpop.f32.mrb[9].mxu0 }
 0x22b   :  { %v800_v45 = vpop.f32.mrb[10].mxu0 }
 0x22c   :  { %803 = vst [vmem:[#allocation8] sm:$0xff] %v798_v43  ;;  %v1009_v46 = vpop.f32.mrb[11].mxu0 }
 0x22d   :  { %1159 = shalt.err (!%p1156_p0)
}
 0x22e   :  { %s1160_s4 = scalar_lea.hbm %s1299_s5, 128 }
 0x22f   :  { %p1161_p1 = scmp.ne.s32.totalorder %s1299_s5, %s1160_s4  ;;  %p1164_p2 = scmp.lt.u32.totalorder %s1160_s4, %s1299_s5 }
 0x231   :  { %p1166_p3 = pnand %p1164_p2, %p1161_p1 }
 0x233   :  { %1169 = shalt.err (!%p1166_p3)
}
 0x234   :  { %813 = dma.vmem_to_hbm [thread:$0]  %s811_s7, 128, %s1299_s5, [#allocation4]  }
 0x235   :  { %1174 = dma.done.wait [#allocation4], 128  }
 0x236   :  { %1175 = vsyncadd [#allocation4], 4294967168 }
 0x237   :  { %817 = vsyncpa [#allocation3], 1 }
 0x238   :  { %818 = vsyncpa [#allocation6], 1 }
 0x239   :  { %819 = vsyncpa [#allocation4], 1 }

</bundles_post_ra>
